<compile_context>
chip_gen: v5e
topology: v5e:2x2
jax: 0.10.0
libtpu: 0.0.40
codegen_flags: <defaults>
</compile_context>

<pallas_src>
import numpy as np
import jax
import jax.numpy as jnp
from jax.experimental import pallas as pl
from jax.experimental.pallas import tpu as pltpu

# ----- small-shape configuration (stands in for 224 / patch14 CLIP ViT) -----
H_PROC = 32                     # processed image side (stands in for 224)
PATCH = 8                       # stands in for patch_size=14/16/32
GRID = H_PROC // PATCH          # 4
N_PATCH = GRID * GRID           # 16 patch tokens
PATCH_DIM = PATCH * PATCH * 3   # 192
WIDTH = 128                     # ViT width
EMBED = 64                      # CLIP joint embedding dim
N_SEGMENTS = (4, 16)            # stands in for [10, 50, 100, 200]
TEMPERATURE = 1.0
HW = H_PROC * H_PROC            # 1024 pixels
HW_TILE = 512                   # lane-dense pixel tile (multiple of 128)

CLIP_MEAN = np.array([0.48145466, 0.4578275, 0.40821073], np.float32)
CLIP_STD = np.array([0.26862954, 0.26130258, 0.27577711], np.float32)


def _round_up(x, m):
    return ((x + m - 1) // m) * m


# --------------------------- Pallas kernel A --------------------------------
# mask scores: patch embed + masked pool + proj + cosine logits + exp(./T)
def _mask_scores_kernel(patchesT_ref, w_patchT_ref, masks_patchT_ref,
                        w_projT_ref, text_ref, vals_ref):
    # 1) patch embedding (ViT conv1 as a matmul), transposed: tokensT (D, P)
    tokens_t = jnp.dot(w_patchT_ref[...], patchesT_ref[...],
                       preferred_element_type=jnp.float32)           # (D, P)

    # 2) masked spatial pooling; 1/counts is already folded into the masks
    #    in the wrapper, so this is a single bf16 MXU matmul.
    pooled_t = jnp.dot(tokens_t.astype(jnp.bfloat16), masks_patchT_ref[...],
                       preferred_element_type=jnp.float32)            # (D, M)

    # 3) projection into the CLIP joint embedding space: featT (C, M)
    feat_t = jnp.dot(w_projT_ref[...], pooled_t.astype(jnp.bfloat16),
                     preferred_element_type=jnp.float32)              # (C, M)

    # 4+5) cosine logits: the L2-norm scale is applied to the (1, M) result
    #      of the text dot instead of the whole (C, M) feature block.
    inv_norm = jax.lax.rsqrt(
        jnp.sum(feat_t * feat_t, axis=0, keepdims=True) + 1e-12)      # (1, M)
    logits = jnp.dot(text_ref[...], feat_t,
                     preferred_element_type=jnp.float32) * inv_norm   # (1, M)

    # 6) per-mask heatmap value; bf16 so kernel B's matmul is MXU-native.
    vals_ref[...] = jnp.exp(logits * (1.0 / TEMPERATURE)).astype(vals_ref.dtype)


# --------------------------- Pallas kernel B --------------------------------
# heatmap numerator, one lane-dense pixel tile per grid step (parallel axis)
def _heatmap_tile_kernel(vals_ref, masks_pix_ref, num_ref):
    num_ref[...] = jnp.dot(vals_ref[...], masks_pix_ref[...],
                           preferred_element_type=jnp.float32)         # (1, HW_TILE)


# ------------------------------ glue (plain JAX) ----------------------------
def get_masks(h, w, n_segments):
    # TODO(synk): SLIC superpixel segmentation (skimage) has no Pallas
    # equivalent; deterministic grid segmentation stands in for it.
    masks = []
    for n in n_segments:
        g = int(round(np.sqrt(n)))
        yy, xx = np.meshgrid(np.arange(h), np.arange(w), indexing="ij")
        seg = (yy // (h // g)) * g + (xx // (w // g))
        for i in np.unique(seg):
            masks.append(seg == i)
    return np.stack(masks, 0)  # (M, h, w) bool


def box_from_heatmap(heatmap, thresh=0.5):
    # TODO(synk): BruteForceBoxSearch + FractionAreaObjective not replicated;
    # simple threshold bounding box instead (with empty-heatmap guard).
    hh, ww = heatmap.shape
    binary = heatmap >= thresh
    any_valid = jnp.any(binary)
    ys = jnp.any(binary, axis=1)
    xs = jnp.any(binary, axis=0)
    yi = jnp.arange(hh)
    xi = jnp.arange(ww)
    y0 = jnp.min(jnp.where(ys, yi, hh - 1))
    y1 = jnp.max(jnp.where(ys, yi, 0))
    x0 = jnp.min(jnp.where(xs, xi, ww - 1))
    x1 = jnp.max(jnp.where(xs, xi, 0))
    box = jnp.stack([x0, y0, x1, y1]).astype(jnp.float32)
    full = jnp.array([0.0, 0.0, ww - 1.0, hh - 1.0], jnp.float32)
    return jnp.where(any_valid, box, full)[None]                  # (1, 4)


def slic_vit_forward(im_u8, masks_bool, w_patch, w_proj, text_features):
    h, w = im_u8.shape[:2]
    m = masks_bool.shape[0]
    m_pad = _round_up(m, 16)        # bf16 sublane tile; zero-padded masks

    # preprocess (im_processed is a forward() output, so it stays in XLA)
    im = im_u8.astype(jnp.float32) / 255.0
    im_processed = (im - CLIP_MEAN) / CLIP_STD                    # (H, W, 3)

    # flatten patches directly in transposed (K, P) orientation so every
    # in-kernel matmul keeps M / P / HW on the lane axis (lane-dense).
    patches = (im_processed.reshape(GRID, PATCH, GRID, PATCH, 3)
               .transpose(0, 2, 1, 3, 4).reshape(N_PATCH, PATCH_DIM))
    patches_t = patches.T.astype(jnp.bfloat16)                    # (K, P)

    # parameters transposed + cast to bf16 (MXU-native, f32 accumulation)
    w_patch_t = w_patch.T.astype(jnp.bfloat16)                    # (D, K)
    w_proj_t = w_proj.T.astype(jnp.bfloat16)                      # (C, D)

    # TODO(synk): the full CLIP masked-attention ViT + text transformer are
    # not replicated; masked pooling + projection of patch tokens stands in
    # for CLIPMaskedSpatialViT, text_features is a synthetic embedding.
    masks_f = masks_bool.astype(jnp.float32)                      # (M, H, W)

    # pooling masks on the patch grid, with 1/counts PRE-FOLDED (mask-only
    # quantity) so the kernel's pooling stage is a single matmul.
    masks_patch = (masks_f.reshape(m, GRID, PATCH, GRID, PATCH)
                   .mean(axis=(2, 4)).reshape(m, N_PATCH))        # (M, P)
    counts = masks_patch.sum(axis=1, keepdims=True)               # (M, 1)
    masks_patch_norm = masks_patch / (counts + 1e-8)
    masks_patch_t = jnp.zeros((N_PATCH, m_pad), jnp.bfloat16)
    masks_patch_t = masks_patch_t.at[:, :m].set(
        masks_patch_norm.T.astype(jnp.bfloat16))                  # (P, M_pad)

    # pixel masks streamed to kernel B as exact {0,1} bf16 (half the bytes of
    # f32); per-pixel denominator + validity are mask-only -> computed in XLA.
    masks_pix = jnp.zeros((m_pad, HW), jnp.bfloat16)
    masks_pix = masks_pix.at[:m, :].set(
        masks_f.reshape(m, HW).astype(jnp.bfloat16))              # (M_pad, HW)
    den = jnp.sum(masks_f.reshape(m, HW), axis=0)                 # (HW,)
    valid = den > 0.0

    # text features: L2-normalize once outside the kernel (constant per call)
    txt = text_features.astype(jnp.float32)
    text_norm = txt / jnp.sqrt(jnp.sum(txt * txt, axis=-1, keepdims=True)
                               + 1e-12)                           # (1, C)

    # ---- kernel A: per-mask scores (runs once, never recomputed per tile) --
    vals = pl.pallas_call(
        _mask_scores_kernel,
        out_shape=jax.ShapeDtypeStruct((1, m_pad), jnp.bfloat16),
        in_specs=[pl.BlockSpec(memory_space=pltpu.MemorySpace.VMEM)] * 5,
        out_specs=pl.BlockSpec(memory_space=pltpu.MemorySpace.VMEM),
    )(patches_t, w_patch_t, masks_patch_t, w_proj_t, text_norm)

    # ---- kernel B: heatmap numerator, gridded over lane-dense pixel tiles --
    num_tiles = HW // HW_TILE
    cost = pl.CostEstimate(
        flops=2 * m_pad * HW,
        transcendentals=0,
        bytes_accessed=m_pad * HW * 2 + m_pad * 2 + HW * 4)
    num = pl.pallas_call(
        _heatmap_tile_kernel,
        out_shape=jax.ShapeDtypeStruct((1, HW), jnp.float32),
        grid=(num_tiles,),
        in_specs=[pl.BlockSpec((1, m_pad), lambda i: (0, 0)),        # resident
                  pl.BlockSpec((m_pad, HW_TILE), lambda i: (0, i))],  # streamed
        out_specs=pl.BlockSpec((1, HW_TILE), lambda i: (0, i)),
        compiler_params=pltpu.CompilerParams(
            dimension_semantics=("parallel",),
            vmem_limit_bytes=32 * 1024 * 1024),
        cost_estimate=cost,
    )(vals, masks_pix)

    # epilogue in XLA on (HW,) arrays: nan-mean division, valid masking and
    # global min/max normalization (the only cross-tile dependency).
    num = num[0]                                                  # (HW,)
    hm = jnp.where(valid, num / jnp.maximum(den, 1.0), 0.0)
    vmin = jnp.min(jnp.where(valid, hm, jnp.inf))
    vmax = jnp.max(jnp.where(valid, hm, -jnp.inf))
    heatmap_flat = jnp.where(valid, (hm - vmin) / (vmax - vmin + 1e-8), 0.0)
    heatmap = heatmap_flat.reshape(H_PROC, H_PROC)

    # box from heatmap + rescale to original image coordinates
    bbox = box_from_heatmap(heatmap)
    bbox = bbox.at[:, ::2].multiply(w / float(H_PROC))
    bbox = bbox.at[:, 1::2].multiply(h / float(H_PROC))

    return im_processed, bbox, heatmap


# ---------------------------------- main ------------------------------------
if __name__ == "__main__":
    key = jax.random.PRNGKey(0)
    k_im, k_wp, k_pr, k_tx = jax.random.split(key, 4)

    # deterministic example inputs / synthetic parameters
    im = jax.random.randint(k_im, (H_PROC, H_PROC, 3), 0, 256,
                            dtype=jnp.int32).astype(jnp.uint8)
    w_patch = (jax.random.normal(k_wp, (PATCH_DIM, WIDTH), jnp.float32)
               * 0.02)
    w_proj = (jax.random.normal(k_pr, (WIDTH, EMBED), jnp.float32) * 0.02)
    text_features = jax.random.normal(k_tx, (1, EMBED), jnp.float32)

    masks_bool = jnp.asarray(get_masks(H_PROC, H_PROC, N_SEGMENTS))  # (20,32,32)

    im_processed, bbox, heatmap = slic_vit_forward(
        im, masks_bool, w_patch, w_proj, text_features)

    jax.block_until_ready((im_processed, bbox, heatmap))
    assert im_processed.shape == (H_PROC, H_PROC, 3)
    assert bbox.shape == (1, 4)
    assert heatmap.shape == (H_PROC, H_PROC)
    assert bool(jnp.all(jnp.isfinite(heatmap)))
    print("KERNEL_OK")
</pallas_src>

<mosaic_0001>
module attributes {stable_mosaic.version = 11 : i64} {
  func.func @_mask_scores_kernel(%arg0: memref<192x16xbf16, #tpu.memory_space<vmem>>, %arg1: memref<128x192xbf16, #tpu.memory_space<vmem>>, %arg2: memref<16x32xbf16, #tpu.memory_space<vmem>>, %arg3: memref<64x128xbf16, #tpu.memory_space<vmem>>, %arg4: memref<1x64xf32, #tpu.memory_space<vmem>>, %arg5: memref<1x32xbf16, #tpu.memory_space<vmem>>) attributes {dimension_semantics = [], scalar_prefetch = 0 : i64, scratch_operands = 0 : i64, tpu.core_type = #tpu.core_type<tc>} {
    %c0 = arith.constant 0 : index
    %c0_0 = arith.constant 0 : index
    %0 = vector.load %arg1[%c0, %c0_0] : memref<128x192xbf16, #tpu.memory_space<vmem>>, vector<128x192xbf16>
    %c0_1 = arith.constant 0 : index
    %c0_2 = arith.constant 0 : index
    %1 = vector.load %arg0[%c0_1, %c0_2] : memref<192x16xbf16, #tpu.memory_space<vmem>>, vector<192x16xbf16>
    %cst = arith.constant dense<0.000000e+00> : vector<128x16xf32>
    %2 = tpu.matmul %0, %1, %cst {dimension_numbers = #tpu.dot_dimension_numbers<[1], [0], [0], [1], [0, 0, 1, 1], [], []>} : vector<128x192xbf16>, vector<192x16xbf16>, vector<128x16xf32> -> vector<128x16xf32>
    %3 = arith.truncf %2 : vector<128x16xf32> to vector<128x16xbf16>
    %c0_3 = arith.constant 0 : index
    %c0_4 = arith.constant 0 : index
    %4 = vector.load %arg2[%c0_3, %c0_4] : memref<16x32xbf16, #tpu.memory_space<vmem>>, vector<16x32xbf16>
    %cst_5 = arith.constant dense<0.000000e+00> : vector<128x32xf32>
    %5 = tpu.matmul %3, %4, %cst_5 {dimension_numbers = #tpu.dot_dimension_numbers<[1], [0], [0], [1], [0, 0, 1, 1], [], []>} : vector<128x16xbf16>, vector<16x32xbf16>, vector<128x32xf32> -> vector<128x32xf32>
    %c0_6 = arith.constant 0 : index
    %c0_7 = arith.constant 0 : index
    %6 = vector.load %arg3[%c0_6, %c0_7] : memref<64x128xbf16, #tpu.memory_space<vmem>>, vector<64x128xbf16>
    %7 = arith.truncf %5 : vector<128x32xf32> to vector<128x32xbf16>
    %cst_8 = arith.constant dense<0.000000e+00> : vector<64x32xf32>
    %8 = tpu.matmul %6, %7, %cst_8 {dimension_numbers = #tpu.dot_dimension_numbers<[1], [0], [0], [1], [0, 0, 1, 1], [], []>} : vector<64x128xbf16>, vector<128x32xbf16>, vector<64x32xf32> -> vector<64x32xf32>
    %9 = arith.mulf %8, %8 : vector<64x32xf32>
    %cst_9 = arith.constant dense<0.000000e+00> : vector<32xf32>
    %10 = vector.multi_reduction <add>, %9, %cst_9 [0] : vector<64x32xf32> to vector<32xf32>
    %11 = vector.shape_cast %10 : vector<32xf32> to vector<1x32xf32>
    %cst_10 = arith.constant 9.99999996E-13 : f32
    %12 = vector.broadcast %cst_10 : f32 to vector<1x32xf32>
    %13 = arith.addf %11, %12 : vector<1x32xf32>
    %14 = math.rsqrt %13 : vector<1x32xf32>
    %c0_11 = arith.constant 0 : index
    %c0_12 = arith.constant 0 : index
    %15 = vector.load %arg4[%c0_11, %c0_12] : memref<1x64xf32, #tpu.memory_space<vmem>>, vector<1x64xf32>
    %cst_13 = arith.constant dense<0.000000e+00> : vector<1x32xf32>
    %16 = tpu.matmul %15, %8, %cst_13 {dimension_numbers = #tpu.dot_dimension_numbers<[1], [0], [0], [1], [0, 0, 1, 1], [], []>} : vector<1x64xf32>, vector<64x32xf32>, vector<1x32xf32> -> vector<1x32xf32>
    %17 = arith.mulf %16, %14 : vector<1x32xf32>
    %cst_14 = arith.constant 1.000000e+00 : f32
    %18 = vector.broadcast %cst_14 : f32 to vector<1x32xf32>
    %19 = arith.mulf %17, %18 : vector<1x32xf32>
    %20 = math.exp %19 : vector<1x32xf32>
    %21 = arith.truncf %20 : vector<1x32xf32> to vector<1x32xbf16>
    %c0_15 = arith.constant 0 : index
    %c0_16 = arith.constant 0 : index
    %22 = vector.load %arg5[%c0_15, %c0_16] : memref<1x32xbf16, #tpu.memory_space<vmem>>, vector<1x32xbf16>
    tpu.vector_store %arg5[%c0_15, %c0_16], %21 {strides = array<i32>} : memref<1x32xbf16, #tpu.memory_space<vmem>>, vector<1x32xbf16>,
    return
  }
}

</mosaic_0001>

<bundles_post_ra>
// kernel: tpu_custom_call.1
= control target key start
LH: loop header
LB: loop body
LE: loop exit
PB: predicated region body
PF: predicated region fallthrough
CT: control target
= control target key end

     0   :  { %s1001_s0 = inlined_call_operand.vmem [shape: bf16[192,16], index: 0, kind: input, shape index: {}]   ;;  %s1002_s1 = inlined_call_operand.vmem [shape: bf16[128,192], index: 1, kind: input, shape index: {}]   ;;  %s1003_s2 = inlined_call_operand.vmem [shape: bf16[16,32], index: 2, kind: input, shape index: {}]   ;;  %s1004_s3 = inlined_call_operand.vmem [shape: bf16[64,128], index: 3, kind: input, shape index: {}]   ;;  %s1005_s4 = inlined_call_operand.vmem [shape: f32[1,64], index: 4, kind: input, shape index: {}]   ;;  %s1006_s5 = inlined_call_operand.hbm [shape: bf16[1,32], index: 5, kind: output, shape index: {}]  }
   0x1   :  { %v751_v0 = vld [vmem:[%s1001_s0 + $0x38] sm:$0xff]  ;;  %v750_v2 = vld [vmem:[%s1001_s0 + $0x30] sm:$0xff]  ;;  %v749_v4 = vld [vmem:[%s1001_s0 + $0x28] sm:$0xff] }
   0x2   :  { %v755_v1 = vld [vmem:[%s1001_s0 + $0x58] sm:$0xff]  ;;  %231 = vmatpush.bf16.msra.mxu0 %v751_v0  ;;  %v754_v3 = vld [vmem:[%s1001_s0 + $0x50] sm:$0xff] }
   0x3   :  { %284 = vmatpush.bf16.msra.mxu1 %v755_v1 }
   0x6   :  { %232 = vmatpush.bf16.msra.mxu0 %v750_v2 }
   0x7   :  { %10 = vsyncpa [#allocation3], 0  ;;  %285 = vmatpush.bf16.msra.mxu1 %v754_v3  ;;  %v753_v5 = vld [vmem:[%s1001_s0 + $0x48] sm:$0xff]  ;;  %v748_v6 = vld [vmem:[%s1001_s0 + $0x20] sm:$0xff]  ;;  %vm206_vm0 = vcmask 523264   ;;  %vm345_vm1 = vcmask 130048  }
   0x8   :  { %v752_v7 = vld [vmem:[%s1001_s0 + $0x40] sm:$0xff]  ;;  %v583_v9 = vld [vmem:[%s1002_s1 + $0x8] sm:$0xf0]  ;;  %v747_v10 = vld [vmem:[%s1001_s0 + $0x18] sm:$0xff]  ;;  %vm496_vm2 = vcmask 261120   ;;  %vm557_vm6 = vcmask 253952  }
   0x9   :  { %v728_v8 = vld [vmem:[%s1002_s1 + $0x4] sm:$0xf]  ;;  %v746_v12 = vld [vmem:[%s1001_s0 + $0x10] sm:$0xff]  ;;  %v745_v13 = vld [vmem:[%s1001_s0 + $0x8] sm:$0xff]  ;;  %vm558_vm7 = vsmask.f32 256 }
   0xa   :  { %233 = vmatpush.bf16.msra.mxu0 %v749_v4  ;;  %v586_v11 = vor.u32 %v728_v8, %v583_v9  ;;  %v744_v14 = vld [vmem:[%s1001_s0] sm:$0xff]  ;;  %v729_v16 = vld [vmem:[%s1002_s1 + $0x4] sm:$0xf0]  ;;  %v730_v17 = vld [vmem:[%s1002_s1 + $0x14] sm:$0xf]  ;;  %s570_s15 = sshll.u32 %s1006_s5, 4  ;;  %s571_s15 = int_to_ptr.hbm [resolvable:$true] %s570_s15 }
   0xb   :  { %286 = vmatpush.bf16.msra.mxu1 %v753_v5  ;;  %v581_v15 = vld [vmem:[%s1002_s1] sm:$0xf]  ;;  %v591_v18 = vld [vmem:[%s1002_s1 + $0x18] sm:$0xf0]  ;;  %v589_v21 = vld [vmem:[%s1002_s1 + $0x10] sm:$0xf] }
   0xc   :  { %v582_v19 = vor.u32 %v729_v16, %v581_v15  ;;  %v594_v20 = vor.u32 %v730_v17, %v591_v18  ;;  %v731_v22 = vld [vmem:[%s1002_s1 + $0x14] sm:$0xf0]  ;;  %v732_v23 = vld [vmem:[%s1002_s1 + $0x24] sm:$0xf]  ;;  %v599_v24 = vld [vmem:[%s1002_s1 + $0x28] sm:$0xf0] }
   0xd   :  { %v590_v25 = vor.u32 %v731_v22, %v589_v21  ;;  %v602_v26 = vor.u32 %v732_v23, %v599_v24  ;;  %v597_v27 = vld [vmem:[%s1002_s1 + $0x20] sm:$0xf]  ;;  %v733_v28 = vld [vmem:[%s1002_s1 + $0x24] sm:$0xf0]  ;;  %v734_v29 = vld [vmem:[%s1002_s1 + $0x34] sm:$0xf] }
   0xe   :  { %234 = vmatpush.bf16.msra.mxu0 %v748_v6  ;;  %v607_v30 = vld [vmem:[%s1002_s1 + $0x38] sm:$0xf0]  ;;  %v598_v31 = vor.u32 %v733_v28, %v597_v27  ;;  %v605_v33 = vld [vmem:[%s1002_s1 + $0x30] sm:$0xf]  ;;  %v735_v34 = vld [vmem:[%s1002_s1 + $0x34] sm:$0xf0] }
   0xf   :  { %287 = vmatpush.bf16.msra.mxu1 %v752_v7  ;;  %v610_v32 = vor.u32 %v734_v29, %v607_v30  ;;  %v736_v35 = vld [vmem:[%s1002_s1 + $0x44] sm:$0xf]  ;;  %v615_v36 = vld [vmem:[%s1002_s1 + $0x48] sm:$0xf0]  ;;  %v606_v37 = vor.u32 %v735_v34, %v605_v33  ;;  %v613_v39 = vld [vmem:[%s1002_s1 + $0x40] sm:$0xf] }
  0x10   :  { %v618_v38 = vor.u32 %v736_v35, %v615_v36  ;;  %v737_v40 = vld [vmem:[%s1002_s1 + $0x44] sm:$0xf0]  ;;  %v738_v41 = vld [vmem:[%s1002_s1 + $0x54] sm:$0xf]  ;;  %v623_v42 = vld [vmem:[%s1002_s1 + $0x58] sm:$0xf0] }
  0x11   :  { %v614_v43 = vor.u32 %v737_v40, %v613_v39  ;;  %v626_v44 = vor.u32 %v738_v41, %v623_v42  ;;  %v621_v45 = vld [vmem:[%s1002_s1 + $0x50] sm:$0xf]  ;;  %v739_v46 = vld [vmem:[%s1002_s1 + $0x54] sm:$0xf0]  ;;  %v740_v47 = vld [vmem:[%s1002_s1 + $0x64] sm:$0xf] }
  0x12   :  { %235 = vmatpush.bf16.msra.mxu0 %v747_v10  ;;  %691 = vmatmul.msk.bf16.vlgmr.msra.gmra.mxu1 %vm206_vm0, %v586_v11  ;;  %v631_v48 = vld [vmem:[%s1002_s1 + $0x68] sm:$0xf0]  ;;  %v622_v49 = vor.u32 %v739_v46, %v621_v45  ;;  %v629_v51 = vld [vmem:[%s1002_s1 + $0x60] sm:$0xf]  ;;  %v741_v52 = vld [vmem:[%s1002_s1 + $0x64] sm:$0xf0] }
  0x13   :  { %v634_v50 = vor.u32 %v740_v47, %v631_v48  ;;  %v742_v53 = vld [vmem:[%s1002_s1 + $0x74] sm:$0xf]  ;;  %v639_v54 = vld [vmem:[%s1002_s1 + $0x78] sm:$0xf0]  ;;  %v630_v55 = vor.u32 %v741_v52, %v629_v51  ;;  %v756_v57 = vld [vmem:[%s1003_s2] sm:$0xff] }
  0x14   :  { %v642_v56 = vor.u32 %v742_v53, %v639_v54  ;;  %377 = vmatpush.bf16.msra.mxu2 %v756_v57  ;;  %v637_v58 = vld [vmem:[%s1002_s1 + $0x70] sm:$0xf]  ;;  %v743_v59 = vld [vmem:[%s1002_s1 + $0x74] sm:$0xf0]  ;;  %vm559_vm8 = vmand %vm557_vm6, %vm558_vm7 }
  0x15   :  { %v638_v60 = vor.u32 %v743_v59, %v637_v58 }
  0x16   :  { %236 = vmatpush.bf16.msra.mxu0 %v746_v12 }
  0x1a   :  { %237 = vmatpush.bf16.msra.mxu0 %v745_v13 }
  0x1e   :  { %238 = vmatpush.bf16.msra.mxu0 %v744_v14 }
  0x21   :  { %239 = vmatmul.bf16.vlgmr.msra.gmra.mxu0 %v582_v19 }
  0x22   :  { %692 = vmatmul.msk.bf16.gmra.mxu1 %vm206_vm0, %v594_v20 }
  0x31   :  { %244 = vmatmul.bf16.gmra.mxu0 %v590_v25 }
  0x32   :  { %693 = vmatmul.msk.bf16.gmra.mxu1 %vm206_vm0, %v602_v26 }
  0x41   :  { %249 = vmatmul.bf16.gmra.mxu0 %v598_v31 }
  0x42   :  { %694 = vmatmul.msk.bf16.gmra.mxu1 %vm206_vm0, %v610_v32 }
  0x51   :  { %254 = vmatmul.bf16.gmra.mxu0 %v606_v37 }
  0x52   :  { %695 = vmatmul.msk.bf16.gmra.mxu1 %vm206_vm0, %v618_v38 }
  0x61   :  { %259 = vmatmul.bf16.gmra.mxu0 %v614_v43 }
  0x62   :  { %696 = vmatmul.msk.bf16.gmra.mxu1 %vm206_vm0, %v626_v44 }
  0x71   :  { %264 = vmatmul.bf16.gmra.mxu0 %v622_v49 }
  0x72   :  { %697 = vmatmul.msk.bf16.gmra.mxu1 %vm206_vm0, %v634_v50 }
  0x81   :  { %269 = vmatmul.bf16.gmra.mxu0 %v630_v55 }
  0x82   :  { %698 = vmatmul.msk.bf16.gmra.mxu1 %vm206_vm0, %v642_v56 }
  0x8f   :  { %v289_v61 = vpop.f32.mrf.mxu1 }
  0x91   :  { %274 = vmatmul.bf16.gmra.mxu0 %v638_v60 }
  0x97   :  { %v291_v62 = vpop.f32.mrf.mxu1 }
  0x9e   :  { %v240_v63 = vpop.f32.mrf.mxu0 }
  0x9f   :  { %v294_v0 = vpop.f32.mrf.mxu1  ;;  %v290_v2 = vadd.f32 %v289_v61, %v240_v63 }
  0xa6   :  { %v242_v1 = vpop.f32.mrf.mxu0 }
  0xa7   :  { %v292_v3 = vadd.f32 %v291_v62, %v242_v1  ;;  %v296_v4 = vpop.f32.mrf.mxu1 }
  0xa9   :  { %v329_v5 = vpack.c.bf16 %v292_v3, %v290_v2 }
  0xab   :  { %703 = vmatmul.msk.bf16.vlgmr.msra.gmra.mxu2 %vm345_vm1, %v329_v5 }
  0xae   :  { %v245_v6 = vpop.f32.mrf.mxu0 }
  0xaf   :  { %v299_v7 = vpop.f32.mrf.mxu1  ;;  %v295_v9 = vadd.f32 %v294_v0, %v245_v6 }
  0xb6   :  { %v247_v8 = vpop.f32.mrf.mxu0 }
  0xb7   :  { %v297_v10 = vadd.f32 %v296_v4, %v247_v8  ;;  %v301_v11 = vpop.f32.mrf.mxu1 }
  0xb9   :  { %v330_v12 = vpack.c.bf16 %v297_v10, %v295_v9 }
  0xbb   :  { %704 = vmatmul.msk.bf16.gmra.mxu2 %vm345_vm1, %v330_v12 }
  0xbe   :  { %v250_v13 = vpop.f32.mrf.mxu0 }
  0xbf   :  { %v304_v14 = vpop.f32.mrf.mxu1  ;;  %v300_v16 = vadd.f32 %v299_v7, %v250_v13  ;;  %v757_v13 = vld [vmem:[%s1004_s3] sm:$0xff] }
  0xc6   :  { %v252_v15 = vpop.f32.mrf.mxu0 }
  0xc7   :  { %v302_v17 = vadd.f32 %v301_v11, %v252_v15  ;;  %v306_v18 = vpop.f32.mrf.mxu1  ;;  %v759_v15 = vld [vmem:[%s1004_s3 + $0x10] sm:$0xff] }
  0xc9   :  { %v331_v19 = vpack.c.bf16 %v302_v17, %v300_v16  ;;  %v760_v16 = vld [vmem:[%s1004_s3 + $0x18] sm:$0xff] }
  0xcb   :  { %705 = vmatmul.msk.bf16.gmra.mxu2 %vm345_vm1, %v331_v19 }
  0xce   :  { %v255_v20 = vpop.f32.mrf.mxu0 }
  0xcf   :  { %v309_v21 = vpop.f32.mrf.mxu1  ;;  %v305_v23 = vadd.f32 %v304_v14, %v255_v20  ;;  %v758_v14 = vld [vmem:[%s1004_s3 + $0x8] sm:$0xff] }
  0xd6   :  { %v257_v22 = vpop.f32.mrf.mxu0 }
  0xd7   :  { %v307_v24 = vadd.f32 %v306_v18, %v257_v22  ;;  %v311_v26 = vpop.f32.mrf.mxu1 }
  0xd9   :  { %v332_v25 = vpack.c.bf16 %v307_v24, %v305_v23 }
  0xdb   :  { %706 = vmatmul.msk.bf16.gmra.mxu2 %vm345_vm1, %v332_v25 }
  0xde   :  { %v260_v27 = vpop.f32.mrf.mxu0 }
  0xdf   :  { %v314_v28 = vpop.f32.mrf.mxu1  ;;  %v310_v30 = vadd.f32 %v309_v21, %v260_v27 }
  0xe6   :  { %v262_v29 = vpop.f32.mrf.mxu0 }
  0xe7   :  { %v312_v31 = vadd.f32 %v311_v26, %v262_v29  ;;  %v316_v34 = vpop.f32.mrf.mxu1 }
  0xe9   :  { %v333_v32 = vpack.c.bf16 %v312_v31, %v310_v30 }
  0xeb   :  { %707 = vmatmul.msk.bf16.gmra.mxu2 %vm345_vm1, %v333_v32 }
  0xee   :  { %v265_v33 = vpop.f32.mrf.mxu0 }
  0xef   :  { %v315_v36 = vadd.f32 %v314_v28, %v265_v33  ;;  %v319_v38 = vpop.f32.mrf.mxu1 }
  0xf6   :  { %v267_v35 = vpop.f32.mrf.mxu0 }
  0xf7   :  { %v317_v37 = vadd.f32 %v316_v34, %v267_v35  ;;  %v321_v41 = vpop.f32.mrf.mxu1 }
  0xf9   :  { %v334_v39 = vpack.c.bf16 %v317_v37, %v315_v36 }
  0xfb   :  { %708 = vmatmul.msk.bf16.gmra.mxu2 %vm345_vm1, %v334_v39 }
  0xfe   :  { %v270_v40 = vpop.f32.mrf.mxu0 }
  0xff   :  { %v320_v43 = vadd.f32 %v319_v38, %v270_v40  ;;  %v324_v46 = vpop.f32.mrf.mxu1 }
 0x106   :  { %v272_v42 = vpop.f32.mrf.mxu0 }
 0x107   :  { %v322_v44 = vadd.f32 %v321_v41, %v272_v42  ;;  %v326_v48 = vpop.f32.mrf.mxu1 }
 0x109   :  { %v335_v45 = vpack.c.bf16 %v322_v44, %v320_v43 }
 0x10b   :  { %709 = vmatmul.msk.bf16.gmra.mxu2 %vm345_vm1, %v335_v45  ;;  %v529_v45 = vld [vmem:[%s1005_s4] sm:$0x1]  ;;  %s792_s4 = smov [#allocation2]  }
 0x10c   :  { %s568_s12 = sshll.u32 %s792_s4, 4  ;;  %s569_s12 = int_to_ptr.vmem [resolvable:$true] %s568_s12 }
 0x10e   :  { %v275_v47 = vpop.f32.mrf.mxu0 }
 0x10f   :  { %v325_v50 = vadd.f32 %v324_v46, %v275_v47 }
 0x116   :  { %v277_v49 = vpop.f32.mrf.mxu0 }
 0x117   :  { %v327_v51 = vadd.f32 %v326_v48, %v277_v49 }
 0x119   :  { %v336_v52 = vpack.c.bf16 %v327_v51, %v325_v50 }
 0x11b   :  { %710 = vmatmul.msk.bf16.gmra.mxu2 %vm345_vm1, %v336_v52 }
 0x12e   :  { %v379_v53 = vpop.f32.mrf.mxu2 }
 0x136   :  { %v381_v54 = vpop.f32.mrf.mxu2 }
 0x137   :  { %v427_v55 = vpack.c.bf16 %v381_v54, %v379_v53 }
 0x13e   :  { %v384_v56 = vpop.f32.mrf.mxu2 }
 0x146   :  { %v386_v57 = vpop.f32.mrf.mxu2 }
 0x147   :  { %v428_v58 = vpack.c.bf16 %v386_v57, %v384_v56 }
 0x14e   :  { %v389_v59 = vpop.f32.mrf.mxu2 }
 0x156   :  { %v391_v60 = vpop.f32.mrf.mxu2 }
 0x157   :  { %v429_v61 = vpack.c.bf16 %v391_v60, %v389_v59 }
 0x15e   :  { %v394_v62 = vpop.f32.mrf.mxu2 }
 0x166   :  { %v396_v63 = vpop.f32.mrf.mxu2 }
 0x167   :  { %v430_v0 = vpack.c.bf16 %v396_v63, %v394_v62 }
 0x16e   :  { %v399_v1 = vpop.f32.mrf.mxu2 }
 0x176   :  { %v401_v2 = vpop.f32.mrf.mxu2 }
 0x177   :  { %v431_v12 = vpack.c.bf16 %v401_v2, %v399_v1 }
 0x17e   :  { %v404_v3 = vpop.f32.mrf.mxu2 }
 0x186   :  { %v406_v4 = vpop.f32.mrf.mxu2 }
 0x187   :  { %v432_v11 = vpack.c.bf16 %v406_v4, %v404_v3  ;;  %v560_v3 = vld [vmem:[#allocation2] sm:$0x1] }
 0x18e   :  { %v409_v5 = vpop.f32.mrf.mxu2 }
 0x196   :  { %v411_v6 = vpop.f32.mrf.mxu2 }
 0x197   :  { %v433_v10 = vpack.c.bf16 %v411_v6, %v409_v5 }
 0x19e   :  { %v414_v7 = vpop.f32.mrf.mxu2 }
 0x1a6   :  { %v416_v8 = vpop.f32.mrf.mxu2 }
 0x1a7   :  { %v434_v9 = vpack.c.bf16 %v416_v8, %v414_v7 }
 0x1a9   :  { %459 = vmatpush.bf16.msra.mxu3 %v434_v9 }
 0x1ad   :  { %460 = vmatpush.bf16.msra.mxu3 %v433_v10 }
 0x1b1   :  { %461 = vmatpush.bf16.msra.mxu3 %v432_v11 }
 0x1b5   :  { %462 = vmatpush.bf16.msra.mxu3 %v431_v12 }
 0x1b9   :  { %463 = vmatpush.bf16.msra.mxu3 %v430_v0 }
 0x1bd   :  { %464 = vmatpush.bf16.msra.mxu3 %v429_v61 }
 0x1c1   :  { %465 = vmatpush.bf16.msra.mxu3 %v428_v58 }
 0x1c5   :  { %466 = vmatpush.bf16.msra.mxu3 %v427_v55 }
 0x1c8   :  { %467 = vmatmul.bf16.vlgmr.msra.gmra.mxu3 %v757_v13 }
 0x1d8   :  { %472 = vmatmul.bf16.gmra.mxu3 %v758_v14 }
 0x1e8   :  { %477 = vmatmul.bf16.gmra.mxu3 %v759_v15 }
 0x1f8   :  { %482 = vmatmul.bf16.gmra.mxu3 %v760_v16 }
 0x24b   :  { %v468_v17 = vpop.f32.mrf.mxu3 }
 0x24c   :  { %v488_v20 = vmul.f32 %v468_v17, %v468_v17 }
 0x24e   :  { %v497_v23 = vsel %vm496_vm2, %v488_v20, 0.0 }
 0x253   :  { %v470_v18 = vpop.f32.mrf.mxu3 }
 0x254   :  { %v489_v19 = vmul.f32 %v470_v18, %v470_v18 }
 0x256   :  { %v498_v21 = vsel %vm496_vm2, %v489_v19, 0.0 }
 0x257   :  { %v499_v25 = vadd.f32 %v498_v21, %v497_v23 }
 0x25b   :  { %v473_v22 = vpop.f32.mrf.mxu3 }
 0x25c   :  { %v490_v24 = vmul.f32 %v473_v22, %v473_v22 }
 0x25e   :  { %v500_v26 = vsel %vm496_vm2, %v490_v24, 0.0 }
 0x25f   :  { %v501_v27 = vadd.f32 %v500_v26, %v499_v25 }
 0x263   :  { %v475_v28 = vpop.f32.mrf.mxu3 }
 0x264   :  { %v491_v29 = vmul.f32 %v475_v28, %v475_v28 }
 0x266   :  { %v502_v30 = vsel %vm496_vm2, %v491_v29, 0.0 }
 0x267   :  { %v503_v31 = vadd.f32 %v502_v30, %v501_v27 }
 0x26b   :  { %v478_v32 = vpop.f32.mrf.mxu3 }
 0x26c   :  { %v492_v33 = vmul.f32 %v478_v32, %v478_v32 }
 0x26e   :  { %v504_v34 = vsel %vm496_vm2, %v492_v33, 0.0 }
 0x26f   :  { %v505_v35 = vadd.f32 %v504_v34, %v503_v31 }
 0x273   :  { %v480_v36 = vpop.f32.mrf.mxu3 }
 0x274   :  { %v493_v37 = vmul.f32 %v480_v36, %v480_v36 }
 0x276   :  { %v506_v38 = vsel %vm496_vm2, %v493_v37, 0.0 }
 0x277   :  { %v507_v39 = vadd.f32 %v506_v38, %v505_v35 }
 0x27b   :  { %v483_v40 = vpop.f32.mrf.mxu3 }
 0x27c   :  { %v494_v41 = vmul.f32 %v483_v40, %v483_v40 }
 0x27e   :  { %v508_v42 = vsel %vm496_vm2, %v494_v41, 0.0 }
 0x27f   :  { %v509_v43 = vadd.f32 %v508_v42, %v507_v39 }
 0x283   :  { %v485_v44 = vpop.f32.mrf.mxu3 }
 0x284   :  { %541 = vmatpush.msrb.mxu3 %v485_v44  ;;  %v495_v46 = vmul.f32 %v485_v44, %v485_v44 }
 0x286   :  { %542 = vmatpush.msrb.mxu3 %v483_v40  ;;  %v510_v47 = vsel %vm496_vm2, %v495_v46, 0.0 }
 0x287   :  { %v511_v48 = vadd.f32 %v510_v47, %v509_v43 }
 0x288   :  { %543 = vmatpush.msrb.mxu3 %v480_v36 }
 0x289   :  { %v512_v49 = vrot.slane %v511_v48, 4 }
 0x28a   :  { %544 = vmatpush.msrb.mxu3 %v478_v32 }
 0x28b   :  { %v513_v50 = vadd.f32 %v512_v49, %v511_v48 }
 0x28c   :  { %545 = vmatpush.msrb.mxu3 %v475_v28 }
 0x28d   :  { %v514_v51 = vrot.slane %v513_v50, 2 }
 0x28e   :  { %546 = vmatpush.msrb.mxu3 %v473_v22 }
 0x28f   :  { %v515_v52 = vadd.f32 %v514_v51, %v513_v50 }
 0x290   :  { %547 = vmatpush.msrb.mxu3 %v470_v18 }
 0x291   :  { %v516_v53 = vrot.slane %v515_v52, 1 }
 0x292   :  { %548 = vmatpush.msrb.mxu3 %v468_v17 }
 0x293   :  { %727 = vmatmul.msk.f32.vlgmr.msrb.gmra.mxu3 %vm206_vm0, %v529_v45  ;;  %v517_v54 = vadd.f32 %v516_v53, %v515_v52 }
 0x295   :  { %v518_v55 = vadd.f32 1e-12, %v517_v54 }
 0x297   :  { %762 = vrsqrt.f32 %v518_v55  ;;  %vm525_vm4 = vweird.f32 %v518_v55 }
 0x29d   :  { %v763_v56 = vpop.eup %762 }
 0x29e   :  { %v520_v57 = vmul.f32 %v763_v56, %v518_v55  ;;  %vm526_vm3 = vweird.f32 %v763_v56 }
 0x29f   :  { %vm527_vm5 = vmor %vm525_vm4, %vm526_vm3 }
 0x2a0   :  { %v521_v58 = vmul.f32 %v763_v56, %v520_v57 }
 0x2a2   :  { %v522_v59 = vmul.f32 0.5, %v521_v58 }
 0x2a4   :  { %v523_v60 = vsub.f32 1.5, %v522_v59 }
 0x2a6   :  { %v524_v61 = vmul.f32 %v763_v56, %v523_v60 }
 0x2a8   :  { %v528_v62 = vsel %vm527_vm5, %v763_v56, %v524_v61 }
 0x316   :  { %v550_v63 = vpop.f32.mrf.mxu3 }
 0x317   :  { %v553_v0 = vmul.f32 %v550_v63, %v528_v62 }
 0x319   :  { %v554_v1 = vmul.f32 1.442695, %v553_v0 }
 0x31b   :  { %764 = vpow2.f32 %v554_v1 }
 0x321   :  { %v765_v2 = vpop.eup %764 }
 0x322   :  { %v556_v4 = vpack.c.bf16 %v765_v2, %v765_v2 }
 0x324   :  { %v561_v5 = vsel %vm559_vm8, %v556_v4, %v560_v3 }
 0x325   :  { %562 = vst [vmem:[#allocation2] sm:$0x1] %v561_v5 }
 0x326   :  { %573 = dma.vmem_to_hbm [thread:$0]  %s569_s12, 16, %s571_s15, [#allocation3]  }
 0x327   :  { %790 = dma.done.wait [#allocation3], 16  }
 0x328   :  { %791 = vsyncadd [#allocation3], 4294967280 }
 0x329   :  { %578 = vsyncpa [#allocation3], 1 }

</bundles_post_ra>
